<compile_context>
chip_gen: v7x
topology: tpu7x:2x2x1
jax: 0.10.0
libtpu: 0.0.40
codegen_flags: <defaults>
</compile_context>

<pallas_src>
import functools

import jax
import jax.numpy as jnp
from jax.experimental import pallas as pl
from jax.experimental.pallas import tpu as pltpu


def _round_up(x, mult):
    return ((x + mult - 1) // mult) * mult


def _mean_system_response_kernel(x_ref, w_ref, y_ref, *, tk):
    """One (M-tile, K-tile) step of y = x @ W, accumulating into the f32 output."""
    k = pl.program_id(1)  # K (reduction) is the last grid axis -> resident output

    @pl.when(k == 0)
    def _():
        y_ref[...] = jnp.zeros_like(y_ref)

    if x_ref.shape[1] == tk:
        # x streamed per K-tile: the block already is the K-tile.
        x_blk = x_ref[...]
    else:
        # x fully resident in VMEM: slice the current K-tile (128-aligned start).
        x_blk = x_ref[:, pl.ds(pl.multiple_of(k * tk, tk), tk)]

    y_ref[...] += jnp.dot(x_blk, w_ref[...], preferred_element_type=jnp.float32)


@functools.partial(
    jax.jit,
    static_argnames=("tk", "tn", "d", "m", "x_resident", "vmem_cap"),
)
def _mean_system_response_forward(x_nchw, w_bf16, *, tk, tn, d, m, x_resident,
                                  vmem_cap):
    """y = A(x) = vec(x) @ W for a [B, C, H, W] batch; returns [B, M]."""
    b = x_nchw.shape[0]
    d_pad, m_pad = w_bf16.shape

    # Row-major flatten (matches torch .view). x traffic is negligible vs W,
    # so the per-call cast/pad here is fine.
    x_flat = x_nchw.reshape(b, -1).astype(jnp.bfloat16)
    assert x_flat.shape[1] == d

    # Pad batch to a multiple of 16 sublanes (full bf16 vreg packing).
    b_pad = _round_up(max(b, 16), 16)
    x_pad = jnp.zeros((b_pad, d_pad), dtype=jnp.bfloat16)
    x_pad = x_pad.at[:b, :d].set(x_flat)

    grid = (m_pad // tn, d_pad // tk)  # (M tiles: parallel, K tiles: arbitrary)

    if x_resident:
        # Constant index map: x DMA'd into VMEM once, reused for every step.
        x_spec = pl.BlockSpec((b_pad, d_pad), lambda j, k: (0, 0))
        x_bytes = 2 * b_pad * d_pad * 2
    else:
        x_spec = pl.BlockSpec((b_pad, tk), lambda j, k: (0, k))
        x_bytes = 2 * b_pad * tk * 2

    # Explicit VMEM budget: double-buffered W tiles + double-buffered f32
    # output tiles + x, with headroom, clamped to the chip's physical VMEM.
    working_set = 2 * tk * tn * 2 + 2 * b_pad * tn * 4 + x_bytes
    vmem_limit = min(vmem_cap, max(32 << 20, int(1.5 * working_set) + (4 << 20)))

    y_pad = pl.pallas_call(
        functools.partial(_mean_system_response_kernel, tk=tk),
        out_shape=jax.ShapeDtypeStruct((b_pad, m_pad), jnp.float32),
        grid_spec=pltpu.PrefetchScalarGridSpec(
            num_scalar_prefetch=0,
            grid=grid,
            in_specs=[
                x_spec,
                pl.BlockSpec((tk, tn), lambda j, k: (k, j)),  # W (K, M)-tile
            ],
            out_specs=pl.BlockSpec((b_pad, tn), lambda j, k: (0, j)),
        ),
        compiler_params=pltpu.CompilerParams(
            dimension_semantics=("parallel", "arbitrary"),
            vmem_limit_bytes=vmem_limit,
        ),
    )(x_pad, w_bf16)

    return y_pad[:b, :m].astype(x_nchw.dtype)


class MeanSystemResponsePallas:
    """Concrete MeanSystemResponse: dense linear system response A(x) = vec(x) @ W.

    W is cast to bf16 and padded to the tile grid exactly once, at init.
    """

    _VMEM_FRACTION = 0.7            # cap working set at a fraction of physical VMEM
    _X_RESIDENT_MAX_BYTES = 8 << 20  # keep x fully resident below this footprint

    def __init__(self, w, *, tk_target=1024, tn_target=4096, max_batch=256,
                 min_m_tiles=2):
        w = jnp.asarray(w, dtype=jnp.float32)
        assert w.ndim == 2
        self.d, self.m = int(w.shape[0]), int(w.shape[1])

        # Generation-aware VMEM capacity (64 MiB on v7x, 128 MiB on v5e/v6e).
        try:
            self._vmem_cap = int(pltpu.get_tpu_info().vmem_capacity_bytes)
        except Exception:
            self._vmem_cap = 64 << 20  # conservative (v7x-sized) default

        b_pad_budget = _round_up(max(max_batch, 16), 16)
        tk, tn, d_pad, m_pad, x_resident = self._select_tiles(
            b_pad_budget, self.d, self.m, tk_target, tn_target, min_m_tiles)
        self.tk, self.tn, self.d_pad, self.m_pad = tk, tn, d_pad, m_pad
        self.x_resident = x_resident

        # One-time bf16 cast + zero-pad of W (zero rows/cols are exact).
        w_pad = jnp.zeros((d_pad, m_pad), dtype=jnp.bfloat16)
        self.w_bf16 = w_pad.at[: self.d, : self.m].set(w.astype(jnp.bfloat16))

    def _select_tiles(self, b_pad, d, m, tk_target, tn_target, min_m_tiles):
        d128 = _round_up(d, 128)
        m128 = _round_up(m, 128)
        tk = min(d128, _round_up(tk_target, 128))
        # Always give the "parallel" M axis >= min_m_tiles tiles (v7x: 2 TCs).
        n_m = max(min_m_tiles, pl.cdiv(m128, tn_target))
        tn = min(_round_up(pl.cdiv(m128, n_m), 128), _round_up(tn_target, 128))

        budget = int(self._VMEM_FRACTION * self._vmem_cap)

        def working_set(tk_, tn_):
            x_full = 2 * b_pad * d128 * 2
            x_term = x_full if x_full <= self._X_RESIDENT_MAX_BYTES else 2 * b_pad * tk_ * 2
            return 2 * tk_ * tn_ * 2 + 2 * b_pad * tn_ * 4 + x_term

        # Shrink tiles (never below 128) until the working set fits the cap.
        while working_set(tk, tn) > budget and (tk > 128 or tn > 128):
            if tk >= tn and tk > 128:
                tk = max(128, _round_up(tk // 2, 128))
            else:
                tn = max(128, _round_up(tn // 2, 128))

        d_pad = _round_up(d128, tk)
        m_pad = _round_up(m128, tn)
        if m_pad // tn < min_m_tiles:
            m_pad = min_m_tiles * tn
        x_resident = 2 * (b_pad * d_pad * 2) <= self._X_RESIDENT_MAX_BYTES
        return tk, tn, d_pad, m_pad, x_resident

    # --- MeanSystemResponse interface ---------------------------------------
    def A(self, x):
        return _mean_system_response_forward(
            x, self.w_bf16,
            tk=self.tk, tn=self.tn, d=self.d, m=self.m,
            x_resident=self.x_resident, vmem_cap=self._vmem_cap)

    def forward(self, x):
        return self.A(x)

    __call__ = forward

    # TODO(synk): AT / pinvATA / pinvA are abstract in the PyTorch base class
    # (NotImplementedError) and are not part of forward(); not implemented.


if __name__ == "__main__":
    # Small deterministic example: B=2, C=4, H=W=16 -> D=1024; M=256 measurements.
    key = jax.random.PRNGKey(0)
    kx, kw = jax.random.split(key)

    B, C, H, W = 2, 4, 16, 16
    D = C * H * W
    M = 256

    x = jax.random.normal(kx, (B, C, H, W), dtype=jnp.float32)
    # Deterministic "system response" weights (synthetic, not a checkpoint).
    w_mat = jax.random.normal(kw, (D, M), dtype=jnp.float32) / jnp.sqrt(D)

    op = MeanSystemResponsePallas(w_mat)   # W cast to bf16 once, here
    y = op.forward(x)
    y = jax.block_until_ready(y)

    # Reference on the same bf16-cast operands (f32 accumulation), plus a
    # looser sanity check vs. the pure-f32 operator.
    x_b = x.reshape(B, D).astype(jnp.bfloat16).astype(jnp.float32)
    w_b = w_mat.astype(jnp.bfloat16).astype(jnp.float32)
    y_ref = x_b @ w_b
    assert y.shape == (B, M)
    assert jnp.allclose(y, y_ref, atol=1e-3, rtol=1e-3)
    assert jnp.allclose(y, x.reshape(B, D) @ w_mat, atol=5e-2, rtol=5e-2)

    print("KERNEL_OK")
</pallas_src>

<mosaic_0001>
module attributes {stable_mosaic.version = 11 : i64} {
  func.func @_mean_system_response_kernel(%arg0: i32, %arg1: i32, %arg2: memref<16x1024xbf16, #tpu.memory_space<vmem>>, %arg3: memref<1024x128xbf16, #tpu.memory_space<vmem>>, %arg4: memref<16x128xf32, #tpu.memory_space<vmem>>) attributes {dimension_semantics = [#tpu.dimension_semantics<parallel>, #tpu.dimension_semantics<arbitrary>], iteration_bounds = array<i64: 2, 1>, scalar_prefetch = 0 : i64, scratch_operands = 0 : i64, tpu.core_type = #tpu.core_type<tc>, window_params = [{pipeline_mode = #tpu.pipeline_mode<synchronous>, transform_indices = @transform_0, window_bounds = array<i64: 16, 1024>}, {transform_indices = @transform_1, window_bounds = array<i64: 1024, 128>}, {transform_indices = @transform_2, window_bounds = array<i64: 16, 128>}]} {
    %c0_i32 = arith.constant 0 : i32
    %0 = arith.cmpi eq, %arg1, %c0_i32 : i32
    %1 = arith.extui %0 : i1 to i32
    %c0_i32_0 = arith.constant 0 : i32
    %2 = arith.cmpi ne, %1, %c0_i32_0 : i32
    scf.if %2 {
      %cst_8 = arith.constant 0.000000e+00 : f32
      %9 = vector.broadcast %cst_8 : f32 to vector<16x128xf32>
      %c0_9 = arith.constant 0 : index
      %c0_10 = arith.constant 0 : index
      %10 = vector.load %arg4[%c0_9, %c0_10] : memref<16x128xf32, #tpu.memory_space<vmem>>, vector<16x128xf32>
      tpu.vector_store %arg4[%c0_9, %c0_10], %9 {strides = array<i32>} : memref<16x128xf32, #tpu.memory_space<vmem>>, vector<16x128xf32>,
    } else {
    }
    %c0 = arith.constant 0 : index
    %c0_1 = arith.constant 0 : index
    %3 = vector.load %arg2[%c0, %c0_1] : memref<16x1024xbf16, #tpu.memory_space<vmem>>, vector<16x1024xbf16>
    %c0_2 = arith.constant 0 : index
    %c0_3 = arith.constant 0 : index
    %4 = vector.load %arg4[%c0_2, %c0_3] : memref<16x128xf32, #tpu.memory_space<vmem>>, vector<16x128xf32>
    %c0_4 = arith.constant 0 : index
    %c0_5 = arith.constant 0 : index
    %5 = vector.load %arg3[%c0_4, %c0_5] : memref<1024x128xbf16, #tpu.memory_space<vmem>>, vector<1024x128xbf16>
    %cst = arith.constant dense<0.000000e+00> : vector<16x128xf32>
    %6 = tpu.matmul %3, %5, %cst {dimension_numbers = #tpu.dot_dimension_numbers<[1], [0], [0], [1], [0, 0, 1, 1], [], []>} : vector<16x1024xbf16>, vector<1024x128xbf16>, vector<16x128xf32> -> vector<16x128xf32>
    %7 = arith.addf %4, %6 : vector<16x128xf32>
    %c0_6 = arith.constant 0 : index
    %c0_7 = arith.constant 0 : index
    %8 = vector.load %arg4[%c0_6, %c0_7] : memref<16x128xf32, #tpu.memory_space<vmem>>, vector<16x128xf32>
    tpu.vector_store %arg4[%c0_6, %c0_7], %7 {strides = array<i32>} : memref<16x128xf32, #tpu.memory_space<vmem>>, vector<16x128xf32>,
    return
  }
  func.func @transform_0(%arg0: i32, %arg1: i32) -> (i32, i32) {
    %c0_i32 = arith.constant 0 : i32
    %c0_i32_0 = arith.constant 0 : i32
    %c0_i32_1 = arith.constant 0 : i32
    return %c0_i32, %c0_i32_0 : i32, i32
  }
  func.func @transform_1(%arg0: i32, %arg1: i32) -> (i32, i32) {
    %c0_i32 = arith.constant 0 : i32
    return %arg1, %arg0 : i32, i32
  }
  func.func @transform_2(%arg0: i32, %arg1: i32) -> (i32, i32) {
    %c0_i32 = arith.constant 0 : i32
    %c0_i32_0 = arith.constant 0 : i32
    return %c0_i32, %arg0 : i32, i32
  }
}

</mosaic_0001>

<bundles_post_ra>
// kernel: _mean_system_response_forward.1
= control target key start
LH: loop header
LB: loop body
LE: loop exit
PB: predicated region body
PF: predicated region fallthrough
CT: control target
= control target key end

     0   :  { %7 = vsyncpa [#allocation3], 0  ;;  %s1652_s0 = inlined_call_operand.vmem [shape: bf16[16,1024], index: 0, kind: input, shape index: {}]   ;;  %s1653_s1 = inlined_call_operand.hbm [shape: bf16[1024,256], index: 1, kind: input, shape index: {}]   ;;  %s1654_s2 = inlined_call_operand.vmem [shape: f32[16,256], index: 2, kind: output, shape index: {}]  }
   0x1   :  { %9 = vsyncpa [#allocation3 + $0x1], 0  ;;  %s1426_s9 = smov 0   ;;  %s1428_s10 = smov 0  }
   0x2   :  { %s1430_s11 = smov 0   ;;  %s1432_s12 = smov 0  }
   0x3   :  { %s1434_s13 = smov 0   ;;  %s1436_s14 = smov 0  }
   0x4 LB: > { %s1029_s15 = sadd.s32 4294967295, %s1405_s14   ;;  %s27_s16 = sadd.s32 1, %s1401_s13  ;;  %s1405_s14 = sphi %s1436_s14, %s15_s14   ;;  %s1401_s13 = sphi %s1434_s13, %s1665_s13   ;;  %s1397_s12 = sphi %s1432_s12, %s1664_s12   ;;  %s1393_s11 = sphi %s1430_s11, %s1663_s11   ;;  %s1389_s10 = sphi %s1428_s10, %s1662_s10   ;;  %s1385_s9 = sphi %s1426_s9, %s1661_s9  }
   0x5   : > { %p29_p0 = scmp.ge.s32.totalorder %s27_s16, 2  ;;  %s57_s17 = sadd.s32 1, %s1393_s11 }
   0x6   : > { %p64_p1 = scmp.ne.s32.totalorder %s1393_s11, %s1389_s10  ;;  %p65_p2 = scmp.eq.s32.totalorder %s1405_s14, 0 }
   0x7   : > { %s1667_s16 = smov (%p29_p0, %s27_s16), 0  ;;  %p70_p4 = scmp.ne.s32.totalorder %s1389_s10, %s1385_s9 }
   0x8   : > { %p1462_p3 = por %p65_p2, %p64_p1  ;;  %s53_s19 = ssub.s32 %s1401_s13, %s1667_s16 }
   0x9   : > { %p71_p5 = scmp.eq.s32.totalorder %s1029_s15, 0  ;;  %p55_p6 = scmp.eq.s32.totalorder %s53_s19, 0 }
   0xa   : > { %p94_p7 = scmp.eq.s32.totalorder %s1029_s15, 1  ;;  %p1208_p10 = scmp.lt.s32.totalorder %s1405_s14, 2 }
   0xb   : > { %p1469_p8 = por %p71_p5, %p70_p4  ;;  %s123_s23 = sand.u32 1, %s1393_s11  }
   0xc   : > { %s1474_s21 = scalar_select %p55_p6, %s1393_s11, %s57_s17  }
   0xd   : > { %p1476_p9 = por %p94_p7, %p64_p1  ;;  %s1034_s24 = sshll.u32 %s1401_s13, 6 }
   0xe   : > { %s1033_s25 = sshll.u32 %s123_s23, 9  ;;  %s1486_s28 = scalar_lea.hbm %s1653_s1, %s1034_s24 }
   0xf   : > { %s1657_s22 = scalar_select %p1476_p9, 1, 0 }
  0x10   : > { %s127_s29 = scalar_lea.vmem [#allocation2], %s1033_s25  ;;  %p1490_p11 = pnand %p1208_p10, %p1462_p3 }
  0x11   : > { %s136_s30 = sshll.u32 %s127_s29, 4  ;;  %s1497_s4 = scalar_lea.sflag [#allocation3], %s123_s23  ;;  %s1494_s30 = int_to_ptr.vmem [resolvable:$true] %s136_s30 }
  0x12   : > { %s1325_s5 = scalar_lea.hbm %s1486_s28, 8192  ;;  %p1327_p0 = pneg %p1490_p11 }
  0x13   : > { %p1326_p13 = scmp.ne.s32.totalorder %s1486_s28, %s1325_s5  ;;  %s1330_s8 = scalar_lea.hbm %s1653_s1, 16384 }
  0x14   : > { %p1331_p3 = scmp.lt.u32.totalorder %s1486_s28, %s1653_s1  ;;  %p1332_p4 = scmp.lt.u32.totalorder %s1330_s8, %s1325_s5 }
  0x15   : > { %p1328_p1 = pnand %p1327_p0, %p1326_p13  ;;  %p1334_p6 = scmp.lt.u32.totalorder %s1325_s5, %s1486_s28 }
  0x16   : > { %p1333_p5 = por %p1332_p4, %p1331_p3 }
  0x17   : > { %p1329_p2 = pneg %p1328_p1 }
  0x18   : > { %p1335_p7 = por %p1334_p6, %p1333_p5 }
  0x1a   : > { %p1336_p10 = pnand %p1335_p7, %p1329_p2 }
  0x1c   : > { %1339 = shalt.err (!%p1336_p10)
}
  0x1d   : > { %s1340_s17 = scalar_lea.vmem %s1494_s30, 8192  ;;  %s1407_s18 = smov [#allocation2]  }
  0x1e   : > { %p1341_p13 = scmp.ne.s32.totalorder %s1494_s30, %s1340_s17  ;;  %s1345_s19 = sshll.u32 %s1407_s18, 4  ;;  %s1346_s19 = int_to_ptr.vmem [resolvable:$false] %s1345_s19 }
  0x1f   : > { %s1347_s23 = scalar_lea.vmem %s1346_s19, 16384  ;;  %p1348_p9 = scmp.lt.s32.totalorder %s1494_s30, %s1346_s19 }
  0x20   : > { %p1343_p1 = pnand %p1341_p13, %p1327_p0  ;;  %p1349_p3 = scmp.lt.s32.totalorder %s1347_s23, %s1340_s17 }
  0x22   : > { %p1344_p12 = pneg %p1343_p1  ;;  %p1350_p4 = por %p1349_p3, %p1348_p9 }
  0x24   : > { %p1351_p5 = pnand %p1350_p4, %p1344_p12 }
  0x26   : > { %1354 = shalt.err (!%p1351_p5)
}
  0x27   : > { %s1408_s24 = smov 128   ;;  %s1409_s25 = smov 64  }
  0x28   : > { %s1410_s26 = smov 4   ;;  %p144_p0 = scmp.lt.s32.totalorder %s1405_s14, 3 }
  0x29   : > { %1207 = dma.hbm_to_vmem [thread:$0]  (!%p1490_p11), %s1486_s28, 8192, %s1494_s30, %s1497_s4, %s1408_s24, %s1409_s25, %s1410_s26  }
  0x2a   : > { %p1659_p2 = scmp.ge.s32.totalorder %s1405_s14, 1 }
  0x2c   : > { %p145_p6 = pnand %p1659_p2, %p144_p0 }
  0x2d   : > { %s1529_s27 = sand.u32 (!%p145_p6), 1, %s1389_s10  }
  0x2e   : > { %148 = sbr.rel (%p145_p6) target bundleno = 350 (0x15e), region = 28  ;;  %s1036_s29 = sshll.u32 (!%p145_p6), %s1529_s27, 9 }
  0x2f   : > { %s151_s5 = scalar_lea.sflag (!%p145_p6), [#allocation3], %s1529_s27  ;;  %s1533_s6 = scalar_lea.vmem (!%p145_p6), [#allocation2], %s1036_s29 }
  0x35   : > { %1380 = dma.done.wait (%p1469_p8), %s151_s5, 8192  }
  0x36   : > { %1382 = vsyncadd (%p1469_p8), %s151_s5, 4294959104  ;;  %v1261_v0 = vld [vmem:[%s1533_s6 + $0x40] sm:$0xff]   ;;  %v1265_v4 = vld [vmem:[%s1533_s6 + $0x48] sm:$0xff]   ;;  %s1037_s29 = sshll.u32 %s1529_s27, 4  ;;  %p1660_p8 = scmp.ne.s32.totalorder %s1657_s22, 0 }
  0x37   : > { %v1262_v1 = vld [vmem:[%s1533_s6 + $0xc0] sm:$0xff]   ;;  %1114 = vmatprep.subr.bf16.mxu0 %v1261_v0  ;;  %v1266_v5 = vld [vmem:[%s1533_s6 + $0xc8] sm:$0xff]   ;;  %v1269_v8 = vld [vmem:[%s1533_s6 + $0x50] sm:$0xff]   ;;  %s173_s5 = scalar_lea.vmem [#allocation4], %s1037_s29 }
  0x38   : > { %v1263_v2 = vld [vmem:[%s1533_s6] sm:$0xff]   ;;  %1136 = vmatprep.subr.bf16.mxu1 %v1262_v1  ;;  %v1267_v6 = vld [vmem:[%s1533_s6 + $0x8] sm:$0xff]   ;;  %v1270_v9 = vld [vmem:[%s1533_s6 + $0xd0] sm:$0xff]  }
  0x39   : > { %v1264_v3 = vld [vmem:[%s1533_s6 + $0x80] sm:$0xff]   ;;  %1115 = vmatpush3.bf16.msra.mxu0 %v1263_v2  ;;  %v1268_v7 = vld [vmem:[%s1533_s6 + $0x88] sm:$0xff]   ;;  %v1271_v10 = vld [vmem:[%s1533_s6 + $0x10] sm:$0xff]  }
  0x3a   : > { %1137 = vmatpush3.bf16.msra.mxu1 %v1264_v3  ;;  %1116 = vmatprep.subr.bf16.mxu0 %v1265_v4  ;;  %v1272_v11 = vld [vmem:[%s1533_s6 + $0x90] sm:$0xff]   ;;  %v1273_v12 = vld [vmem:[%s1533_s6 + $0x58] sm:$0xff]   ;;  %v1277_v16 = vld [vmem:[%s1533_s6 + $0x60] sm:$0xff]  }
  0x3b   : > { %1138 = vmatprep.subr.bf16.mxu1 %v1266_v5  ;;  %v1274_v13 = vld [vmem:[%s1533_s6 + $0xd8] sm:$0xff]   ;;  %v1278_v17 = vld [vmem:[%s1533_s6 + $0xe0] sm:$0xff]   ;;  %v1281_v20 = vld [vmem:[%s1533_s6 + $0x68] sm:$0xff]  }
  0x3c   : > { %v1275_v14 = vld [vmem:[%s1533_s6 + $0x18] sm:$0xff]   ;;  %v1279_v18 = vld [vmem:[%s1533_s6 + $0x20] sm:$0xff]   ;;  %v1282_v21 = vld [vmem:[%s1533_s6 + $0xe8] sm:$0xff]  }
  0x3d   : > { %1117 = vmatpush3.bf16.msra.mxu0 %v1267_v6  ;;  %v1276_v15 = vld [vmem:[%s1533_s6 + $0x98] sm:$0xff]   ;;  %v1280_v19 = vld [vmem:[%s1533_s6 + $0xa0] sm:$0xff]   ;;  %v1283_v22 = vld [vmem:[%s1533_s6 + $0x28] sm:$0xff]  }
  0x3e   : > { %1139 = vmatpush3.bf16.msra.mxu1 %v1268_v7  ;;  %1118 = vmatprep.subr.bf16.mxu0 %v1269_v8  ;;  %v1284_v23 = vld [vmem:[%s1533_s6 + $0xa8] sm:$0xff]   ;;  %v1285_v24 = vld [vmem:[%s1533_s6 + $0x70] sm:$0xff]   ;;  %v1289_v28 = vld [vmem:[%s1533_s6 + $0x78] sm:$0xff]  }
  0x3f   : > { %1140 = vmatprep.subr.bf16.mxu1 %v1270_v9  ;;  %v1286_v25 = vld [vmem:[%s1533_s6 + $0xf0] sm:$0xff]   ;;  %v1290_v29 = vld [vmem:[%s1533_s6 + $0xf8] sm:$0xff]   ;;  %v182_v32 = vld [vmem:[%s1652_s0] sm:$0xff] }
  0x40   : > { %v1287_v26 = vld [vmem:[%s1533_s6 + $0x30] sm:$0xff]   ;;  %v1291_v30 = vld [vmem:[%s1533_s6 + $0x38] sm:$0xff]   ;;  %v186_v33 = vld [vmem:[%s1652_s0 + $0x20] sm:$0xff] }
  0x41   : > { %1119 = vmatpush3.bf16.msra.mxu0 %v1271_v10  ;;  %v1288_v27 = vld [vmem:[%s1533_s6 + $0xb0] sm:$0xff]   ;;  %v1292_v31 = vld [vmem:[%s1533_s6 + $0xb8] sm:$0xff]   ;;  %v183_v34 = vld [vmem:[%s1652_s0 + $0x8] sm:$0xff]  ;;  %v1038_v35 = vcombine.low %v182_v32, %v186_v33  ;;  %v1039_v36 = vcombine.high %v182_v32, %v186_v33 }
  0x42   : > { %1141 = vmatpush3.bf16.msra.mxu1 %v1272_v11  ;;  %1120 = vmatprep.subr.bf16.mxu0 %v1273_v12  ;;  %v187_v37 = vld [vmem:[%s1652_s0 + $0x28] sm:$0xff]  ;;  %v1293_v40 = vld [vmem:[%s1533_s6 + $0x140] sm:$0xff]   ;;  %v1301_v48 = vld [vmem:[%s1533_s6 + $0x150] sm:$0xff]  }
  0x43   : > { %1142 = vmatprep.subr.bf16.mxu1 %v1274_v13  ;;  %v1040_v38 = vcombine.low %v183_v34, %v187_v37  ;;  %v1041_v39 = vcombine.high %v183_v34, %v187_v37  ;;  %776 = vmatprep.mubr.bf16.mxu0 %v1039_v36  ;;  %v1294_v41 = vld [vmem:[%s1533_s6 + $0x1c0] sm:$0xff]   ;;  %v1297_v44 = vld [vmem:[%s1533_s6 + $0x148] sm:$0xff]   ;;  %v1302_v49 = vld [vmem:[%s1533_s6 + $0x1d0] sm:$0xff]  }
  0x44   : > { %v1295_v42 = vld [vmem:[%s1533_s6 + $0x100] sm:$0xff]   ;;  %v1298_v45 = vld [vmem:[%s1533_s6 + $0x1c8] sm:$0xff]   ;;  %v1303_v50 = vld [vmem:[%s1533_s6 + $0x110] sm:$0xff]  }
  0x45   : > { %1121 = vmatpush3.bf16.msra.mxu0 %v1275_v14  ;;  %817 = vmatprep.mubr.bf16.mxu1 %v1041_v39  ;;  %v1296_v43 = vld [vmem:[%s1533_s6 + $0x180] sm:$0xff]   ;;  %v1299_v46 = vld [vmem:[%s1533_s6 + $0x108] sm:$0xff]   ;;  %v1304_v51 = vld [vmem:[%s1533_s6 + $0x190] sm:$0xff]  }
  0x46   : > { %1143 = vmatpush3.bf16.msra.mxu1 %v1276_v15  ;;  %1122 = vmatprep.subr.bf16.mxu0 %v1277_v16  ;;  %v1300_v47 = vld [vmem:[%s1533_s6 + $0x188] sm:$0xff]   ;;  %v1305_v52 = vld [vmem:[%s1533_s6 + $0x158] sm:$0xff]   ;;  %v1309_v56 = vld [vmem:[%s1533_s6 + $0x160] sm:$0xff]  }
  0x47   : > { %1144 = vmatprep.subr.bf16.mxu1 %v1278_v17  ;;  %v1306_v53 = vld [vmem:[%s1533_s6 + $0x1d8] sm:$0xff]   ;;  %v1310_v57 = vld [vmem:[%s1533_s6 + $0x1e0] sm:$0xff]   ;;  %v1313_v60 = vld [vmem:[%s1533_s6 + $0x168] sm:$0xff]  }
  0x48   : > { %v1307_v54 = vld [vmem:[%s1533_s6 + $0x118] sm:$0xff]   ;;  %v1311_v58 = vld [vmem:[%s1533_s6 + $0x120] sm:$0xff]   ;;  %v1314_v61 = vld [vmem:[%s1533_s6 + $0x1e8] sm:$0xff]  }
  0x49   : > { %1123 = vmatpush3.bf16.msra.mxu0 %v1279_v18  ;;  %v1308_v55 = vld [vmem:[%s1533_s6 + $0x198] sm:$0xff]   ;;  %v1312_v59 = vld [vmem:[%s1533_s6 + $0x1a0] sm:$0xff]   ;;  %v1315_v62 = vld [vmem:[%s1533_s6 + $0x128] sm:$0xff]  }
  0x4a   : > { %1145 = vmatpush3.bf16.msra.mxu1 %v1280_v19  ;;  %1124 = vmatprep.subr.bf16.mxu0 %v1281_v20  ;;  %v1316_v63 = vld [vmem:[%s1533_s6 + $0x1a8] sm:$0xff]   ;;  %v1317_v0 = vld [vmem:[%s1533_s6 + $0x170] sm:$0xff]   ;;  %v1321_v4 = vld [vmem:[%s1533_s6 + $0x178] sm:$0xff]  }
  0x4b   : > { %1146 = vmatprep.subr.bf16.mxu1 %v1282_v21  ;;  %v1318_v1 = vld [vmem:[%s1533_s6 + $0x1f0] sm:$0xff]   ;;  %v1322_v5 = vld [vmem:[%s1533_s6 + $0x1f8] sm:$0xff]  }
  0x4c   : > { %v1319_v2 = vld [vmem:[%s1533_s6 + $0x130] sm:$0xff]   ;;  %v1323_v6 = vld [vmem:[%s1533_s6 + $0x138] sm:$0xff]  }
  0x4d   : > { %1125 = vmatpush3.bf16.msra.mxu0 %v1283_v22  ;;  %v1320_v3 = vld [vmem:[%s1533_s6 + $0x1b0] sm:$0xff]   ;;  %v1324_v7 = vld [vmem:[%s1533_s6 + $0x1b8] sm:$0xff]   ;;  %s1111_s6 = sshll.u32 (%p1660_p8), %s1397_s12, 3 }
  0x4e   : > { %1147 = vmatpush3.bf16.msra.mxu1 %v1284_v23  ;;  %1126 = vmatprep.subr.bf16.mxu0 %v1285_v24  ;;  %v184_v8 = vld [vmem:[%s1652_s0 + $0x10] sm:$0xff]  ;;  %v185_v12 = vld [vmem:[%s1652_s0 + $0x18] sm:$0xff]  ;;  %s920_s27 = scalar_lea.vmem (%p1660_p8), %s1654_s2, %s1111_s6 }
  0x4f   : > { %1148 = vmatprep.subr.bf16.mxu1 %v1286_v25  ;;  %v188_v9 = vld [vmem:[%s1652_s0 + $0x30] sm:$0xff]  ;;  %v189_v13 = vld [vmem:[%s1652_s0 + $0x38] sm:$0xff] }
  0x50   : > { %v1042_v10 = vcombine.low %v184_v8, %v188_v9  ;;  %v1043_v11 = vcombine.high %v184_v8, %v188_v9  ;;  %v1044_v14 = vcombine.low %v185_v12, %v189_v13  ;;  %v1045_v15 = vcombine.high %v185_v12, %v189_v13 }
  0x51   : > { %1127 = vmatpush3.bf16.msra.mxu0 %v1287_v26 }
  0x52   : > { %1149 = vmatpush3.bf16.msra.mxu1 %v1288_v27  ;;  %1128 = vmatprep.subr.bf16.mxu0 %v1289_v28 }
  0x53   : > { %1150 = vmatprep.subr.bf16.mxu1 %v1290_v29 }
  0x55   : > { %1129 = vmatpush3.bf16.msra.mxu0 %v1291_v30 }
  0x56   : > { %1151 = vmatpush3.bf16.msra.mxu1 %v1292_v31  ;;  %1158 = vmatprep.subr.bf16.mxu0 %v1293_v40 }
  0x57   : > { %1180 = vmatprep.subr.bf16.mxu1 %v1294_v41 }
  0x58   : > { %777 = vmatmul.mubr.bf16.vlgmr.msra.gmra.mrb[0].mxu0 %v1038_v35 }
  0x59   : > { %818 = vmatmul.mubr.bf16.vlgmr.msra.gmra.mrb[0].mxu1 %v1040_v38  ;;  %1159 = vmatpush3.bf16.msra.mxu0 %v1295_v42 }
  0x5a   : > { %1181 = vmatpush3.bf16.msra.mxu1 %v1296_v43  ;;  %1160 = vmatprep.subr.bf16.mxu0 %v1297_v44 }
  0x5b   : > { %1182 = vmatprep.subr.bf16.mxu1 %v1298_v45  ;;  %858 = vmatprep.mubr.bf16.mxu0 %v1043_v11 }
  0x5c   : > { %899 = vmatprep.mubr.bf16.mxu1 %v1045_v15 }
  0x5d   : > { %1161 = vmatpush3.bf16.msra.mxu0 %v1299_v46 }
  0x5e   : > { %1183 = vmatpush3.bf16.msra.mxu1 %v1300_v47  ;;  %1162 = vmatprep.subr.bf16.mxu0 %v1301_v48 }
  0x5f   : > { %1184 = vmatprep.subr.bf16.mxu1 %v1302_v49 }
  0x61   : > { %1163 = vmatpush3.bf16.msra.mxu0 %v1303_v50 }
  0x62   : > { %1185 = vmatpush3.bf16.msra.mxu1 %v1304_v51  ;;  %1164 = vmatprep.subr.bf16.mxu0 %v1305_v52 }
  0x63   : > { %1186 = vmatprep.subr.bf16.mxu1 %v1306_v53 }
  0x65   : > { %1165 = vmatpush3.bf16.msra.mxu0 %v1307_v54 }
  0x66   : > { %1187 = vmatpush3.bf16.msra.mxu1 %v1308_v55  ;;  %1166 = vmatprep.subr.bf16.mxu0 %v1309_v56 }
  0x67   : > { %1188 = vmatprep.subr.bf16.mxu1 %v1310_v57 }
  0x69   : > { %1167 = vmatpush3.bf16.msra.mxu0 %v1311_v58 }
  0x6a   : > { %1189 = vmatpush3.bf16.msra.mxu1 %v1312_v59  ;;  %1168 = vmatprep.subr.bf16.mxu0 %v1313_v60 }
  0x6b   : > { %1190 = vmatprep.subr.bf16.mxu1 %v1314_v61 }
  0x6d   : > { %1169 = vmatpush3.bf16.msra.mxu0 %v1315_v62 }
  0x6e   : > { %1191 = vmatpush3.bf16.msra.mxu1 %v1316_v63  ;;  %1170 = vmatprep.subr.bf16.mxu0 %v1317_v0 }
  0x6f   : > { %1192 = vmatprep.subr.bf16.mxu1 %v1318_v1 }
  0x71   : > { %1171 = vmatpush3.bf16.msra.mxu0 %v1319_v2 }
  0x72   : > { %1193 = vmatpush3.bf16.msra.mxu1 %v1320_v3  ;;  %1172 = vmatprep.subr.bf16.mxu0 %v1321_v4 }
  0x73   : > { %1194 = vmatprep.subr.bf16.mxu1 %v1322_v5 }
  0x75   : > { %1173 = vmatpush3.bf16.msra.mxu0 %v1323_v6 }
  0x76   : > { %1195 = vmatpush3.bf16.msra.mxu1 %v1324_v7 }
  0x78   : > { %859 = vmatmul.mubr.bf16.vlgmr.msra.gmra.mrb[4].mxu0 %v1042_v10 }
  0x79   : > { %900 = vmatmul.mubr.bf16.vlgmr.msra.gmra.mrb[4].mxu1 %v1044_v14 }
 0x12b   : > { %v1130_v16 = vpop.f32.mrb[0].mxu0 }
 0x12c   : > { %v1152_v17 = vpop.f32.mrb[0].mxu1  ;;  %v1131_v18 = vpop.f32.mrb[1].mxu0 }
 0x12d   : > { %v1132_v19 = vadd.f32 %v1131_v18, %v1130_v16  ;;  %v1153_v20 = vpop.f32.mrb[1].mxu1  ;;  %v1133_v21 = vpop.f32.mrb[2].mxu0 }
 0x12e   : > { %v1154_v22 = vadd.f32 %v1153_v20, %v1152_v17  ;;  %v1155_v23 = vpop.f32.mrb[2].mxu1  ;;  %v1134_v24 = vpop.f32.mrb[3].mxu0 }
 0x12f   : > { %v1135_v25 = vadd.f32 %v1134_v24, %v1133_v21  ;;  %v1156_v26 = vpop.f32.mrb[3].mxu1 }
 0x130   : > { %v820_v27 = vadd.f32 %v1154_v22, %v1132_v19  ;;  %v1157_v28 = vadd.f32 %v1156_v26, %v1155_v23 }
 0x132   : > { %v823_v29 = vadd.f32 %v1157_v28, %v1135_v25 }
 0x14b   : > { %v1174_v30 = vpop.f32.mrb[4].mxu0 }
 0x14c   : > { %v1196_v31 = vpop.f32.mrb[4].mxu1  ;;  %v1175_v32 = vpop.f32.mrb[5].mxu0 }
 0x14d   : > { %v1176_v33 = vadd.f32 %v1175_v32, %v1174_v30  ;;  %v1197_v34 = vpop.f32.mrb[5].mxu1  ;;  %v1177_v35 = vpop.f32.mrb[6].mxu0 }
 0x14e   : > { %v1198_v36 = vadd.f32 %v1197_v34, %v1196_v31  ;;  %v1199_v37 = vpop.f32.mrb[6].mxu1  ;;  %v1178_v38 = vpop.f32.mrb[7].mxu0 }
 0x14f   : > { %v861_v39 = vadd.f32 %v1176_v33, %v820_v27  ;;  %v1179_v40 = vadd.f32 %v1178_v38, %v1177_v35  ;;  %v1200_v41 = vpop.f32.mrb[7].mxu1  ;;  %918 = sbr.rel (!%p1660_p8) target bundleno = 350 (0x15e), region = 40 }
 0x150   : > { %v1201_v42 = vadd.f32 %v1200_v41, %v1199_v37 }
 0x151   : > { %v902_v43 = vadd.f32 %v1198_v36, %v861_v39  ;;  %v864_v44 = vadd.f32 %v1179_v40, %v823_v29 }
 0x153   : > { %v905_v45 = vadd.f32 %v1201_v42, %v864_v44  ;;  %910 = vst [vmem:[%s173_s5] sm:$0xff] %v902_v43 }
 0x155   : > { %911 = vst [vmem:[%s173_s5 + $0x8] sm:$0xff] %v905_v45 }
 0x15a   : > { %v950_v46 = vld [vmem:[%s173_s5] sm:$0xff] }
 0x15b   : > { %951 = vst [vmem:[%s920_s27] sm:$0xff] %v950_v46 }
 0x15c   : > { %v952_v47 = vld [vmem:[%s173_s5 + $0x8] sm:$0xff] }
 0x15d   : > { %953 = vst [vmem:[%s920_s27 + $0x10] sm:$0xff] %v952_v47 }
 0x15e PF: > { %s15_s14 = sadd.s32 1, %s1405_s14   ;;  %s1661_s9 = smov %s1389_s10 }
 0x15f   : > { %p12_p9 = scmp.ge.s32.totalorder %s15_s14, 4   ;;  %s1662_s10 = smov %s1393_s11 }
 0x160   : > { %s1663_s11 = smov %s1474_s21  ;;  %s1664_s12 = smov %s1401_s13 }
 0x161   : > { %s1665_s13 = smov %s1667_s16  ;;  %14 = sbr.rel (!%p12_p9) target bundleno = 4 (0x4), region = 110 }
 0x168   :  { %969 = vsyncpa [#allocation3], 1 }
 0x169   :  { %971 = vsyncpa [#allocation3 + $0x1], 1 }

</bundles_post_ra>
